<compile_context>
chip_gen: v7x
topology: tpu7x:2x2x1
jax: 0.10.0
libtpu: 0.0.40
codegen_flags: <defaults>
</compile_context>

<pallas_src>
import functools

import numpy as np
import jax
import jax.numpy as jnp
from jax import lax
from jax.experimental import pallas as pl
from jax.experimental.pallas import tpu as pltpu


def _lightconv_kernel(x_ref, w1_ref, b1_ref, w2_ref, b2_ref, m_ref, out_ref, acc_ref,
                      *, H, W, K, pad):
    """Fused LightConv forward for one batch element (channels-in-sublane layout).

    x_ref  : [1, C1P, H*W]  input activations (NCHW, spatial flattened into lanes)
    w1_ref : [C2P, C1P]     1x1 conv weight, BN1 scale folded in
    b1_ref : [C2P, 1]       BN1 shift
    w2_ref : [C2P, K*K]     depthwise weight (flattened taps), BN2 scale folded in
    b2_ref : [C2P, 1]       BN2 shift
    m_ref  : [K*K, H*W]     per-tap validity masks (1.0 inside the image, 0.0 at halo)
    out_ref: [1, C2P, H*W]
    acc_ref: VMEM f32 [C2P, H*W] depthwise accumulator
    """
    HW = H * W

    # ---- conv1: 1x1 pointwise conv (one small GEMM) + BN1 shift ---------------------
    y1 = jnp.dot(w1_ref[...], x_ref[0], preferred_element_type=jnp.float32)
    y1 = y1 + b1_ref[...]                                          # [C2P, HW]

    # ---- conv2: depthwise KxK conv = lane rolls + masked FMAs, in-place accumulate --
    tc = pad * K + pad                                             # centre tap (always valid)
    acc_ref[...] = y1 * w2_ref[:, tc:tc + 1]
    for t in range(K * K):
        if t == tc:
            continue
        di, dj = divmod(t, K)
        a, b = di - pad, dj - pad
        shift = (-(a * W + b)) % HW                                # out[f] <- y1[f + a*W + b]
        shifted = pltpu.roll(y1, shift, axis=1)                    # XLU rotation (circular)
        acc_ref[...] += (shifted * m_ref[t:t + 1, :]) * w2_ref[:, t:t + 1]

    # ---- BN2 shift + ReLU ------------------------------------------------------------
    out_ref[0] = jnp.maximum(acc_ref[...] + b2_ref[...], 0.0).astype(out_ref.dtype)


@functools.partial(jax.jit, static_argnames=("k", "eps"))
def light_conv(x, w1, g1, b1, m1, v1, w2, g2, b2, m2, v2, *, k=3, eps=1e-5):
    """LightConv forward:
         y = ReLU( BN2( DWConv_kxk( BN1( Conv1x1(x) ) ) ) )
    x: [N, C1, H, W] (NCHW), w1: [C2, C1, 1, 1], w2: [C2, 1, k, k].
    BatchNorm uses inference (running) statistics, folded into the conv weights.
    """
    # TODO(synk): training-mode BatchNorm (batch-statistics update) is not implemented;
    #             only the inference forward (running stats) is computed here.
    n, c1, h, w = x.shape
    c2 = w1.shape[0]
    pad = k // 2                                     # autopad(k, None, d=1)
    hw = h * w
    c1p = ((c1 + 7) // 8) * 8                        # sublane-dense channel counts
    c2p = ((c2 + 7) // 8) * 8
    f32 = jnp.float32

    # ---- fold BN1 into the 1x1 weights ----------------------------------------------
    s1 = (g1 / jnp.sqrt(v1 + eps)).astype(f32)
    w1m = w1.reshape(c2, c1).astype(f32) * s1[:, None]             # [C2, C1]
    sh1 = (b1 - m1 * (g1 / jnp.sqrt(v1 + eps))).astype(f32)        # [C2]

    # ---- fold BN2 into the depthwise weights -----------------------------------------
    s2 = (g2 / jnp.sqrt(v2 + eps)).astype(f32)
    w2m = (w2[:, 0].astype(f32) * s2[:, None, None]).reshape(c2, k * k)   # [C2, K*K]
    sh2 = (b2 - m2 * (g2 / jnp.sqrt(v2 + eps))).astype(f32)        # [C2]

    # ---- sublane-pad channels (padded rows produce exact zeros, sliced off later) ----
    w1p = jnp.zeros((c2p, c1p), f32).at[:c2, :c1].set(w1m)
    sh1p = jnp.zeros((c2p, 1), f32).at[:c2, 0].set(sh1)
    w2p = jnp.zeros((c2p, k * k), f32).at[:c2].set(w2m)
    sh2p = jnp.zeros((c2p, 1), f32).at[:c2, 0].set(sh2)

    # ---- per-tap edge-validity masks over the flattened spatial axis (constants) -----
    hh = np.arange(h)[:, None]
    ww = np.arange(w)[None, :]
    masks_np = np.empty((k * k, hw), np.float32)
    for t in range(k * k):
        di, dj = divmod(t, k)
        a, b_off = di - pad, dj - pad
        valid = (hh + a >= 0) & (hh + a < h) & (ww + b_off >= 0) & (ww + b_off < w)
        masks_np[t] = valid.reshape(-1).astype(np.float32)
    masks = jnp.asarray(masks_np)

    # NCHW with spatial flattened into the lane dim: free reshape, no transpose.
    x_flat = x.reshape(n, c1, hw)
    if c1p != c1:
        x_flat = jnp.pad(x_flat, ((0, 0), (0, c1p - c1), (0, 0)))

    kern = functools.partial(_lightconv_kernel, H=h, W=w, K=k, pad=pad)

    # Explicit VMEM budget (inputs double-buffered + out block + accumulator + consts).
    block_bytes = ((c1p + 2 * c2p) * hw * x.dtype.itemsize
                   + (c2p * hw + k * k * hw + c2p * (c1p + k * k + 2)) * 4)
    vmem_limit = int(min(max(6 * block_bytes, 8 << 20), 32 << 20))

    # TODO(synk): for large H*W (HGNetV2 56-112 spatial) add an H-halo grid axis, and a
    #             channel-tile axis when c2 >> 128, so the per-step block fits v7x's
    #             64 MiB VMEM; bf16 MXU inputs are the other lever for big-channel runs.
    out = pl.pallas_call(
        kern,
        out_shape=jax.ShapeDtypeStruct((n, c2p, hw), x.dtype),
        grid_spec=pltpu.PrefetchScalarGridSpec(
            num_scalar_prefetch=0,
            grid=(n,),
            in_specs=[
                pl.BlockSpec((1, c1p, hw), lambda i: (i, 0, 0)),
                pl.BlockSpec((c2p, c1p), lambda i: (0, 0)),
                pl.BlockSpec((c2p, 1), lambda i: (0, 0)),
                pl.BlockSpec((c2p, k * k), lambda i: (0, 0)),
                pl.BlockSpec((c2p, 1), lambda i: (0, 0)),
                pl.BlockSpec((k * k, hw), lambda i: (0, 0)),
            ],
            out_specs=pl.BlockSpec((1, c2p, hw), lambda i: (i, 0, 0)),
            scratch_shapes=[pltpu.VMEM((c2p, hw), jnp.float32)],
        ),
        compiler_params=pltpu.CompilerParams(
            dimension_semantics=("parallel",),
            vmem_limit_bytes=vmem_limit),
    )(x_flat, w1p, sh1p, w2p, sh2p, masks)

    if c2p != c2:
        out = out[:, :c2]
    return out.reshape(n, c2, h, w)                   # free reshape back to NCHW


def _reference(x, w1, g1, b1, m1, v1, w2, g2, b2, m2, v2, *, k, eps=1e-5):
    """Pure-JAX reference of LightConv.forward (inference BN, ReLU act)."""
    def bn(y, g, b, m, v):
        s = g / jnp.sqrt(v + eps)
        return y * s[None, :, None, None] + (b - m * s)[None, :, None, None]

    y = lax.conv_general_dilated(
        x, w1, window_strides=(1, 1), padding=[(0, 0), (0, 0)],
        dimension_numbers=("NCHW", "OIHW", "NCHW"),
        precision=lax.Precision.HIGHEST)
    y = bn(y, g1, b1, m1, v1)

    p = k // 2
    c2 = w2.shape[0]
    y = lax.conv_general_dilated(
        y, w2, window_strides=(1, 1), padding=[(p, p), (p, p)],
        dimension_numbers=("NCHW", "OIHW", "NCHW"),
        feature_group_count=c2,
        precision=lax.Precision.HIGHEST)
    y = bn(y, g2, b2, m2, v2)
    return jnp.maximum(y, 0.0)


if __name__ == "__main__":
    # LightConv(c1=4, c2=8, k=3, act=ReLU) on a small synthetic input.
    N, C1, H, W = 2, 4, 16, 16
    C2, K = 8, 3

    key = jax.random.PRNGKey(0)
    ks = jax.random.split(key, 11)
    x = jax.random.normal(ks[0], (N, C1, H, W), dtype=jnp.float32)
    # conv1 (1x1, bias=False) + BN1 (inference stats)
    w1 = jax.random.normal(ks[1], (C2, C1, 1, 1), dtype=jnp.float32) * 0.1
    g1 = 1.0 + 0.1 * jax.random.normal(ks[2], (C2,), dtype=jnp.float32)
    b1 = 0.1 * jax.random.normal(ks[3], (C2,), dtype=jnp.float32)
    m1 = 0.1 * jax.random.normal(ks[4], (C2,), dtype=jnp.float32)
    v1 = 1.0 + 0.1 * jax.random.uniform(ks[5], (C2,), dtype=jnp.float32)
    # conv2 (depthwise 3x3, groups=C2, bias=False) + BN2 (inference stats)
    w2 = jax.random.normal(ks[6], (C2, 1, K, K), dtype=jnp.float32) * 0.1
    g2 = 1.0 + 0.1 * jax.random.normal(ks[7], (C2,), dtype=jnp.float32)
    b2 = 0.1 * jax.random.normal(ks[8], (C2,), dtype=jnp.float32)
    m2 = 0.1 * jax.random.normal(ks[9], (C2,), dtype=jnp.float32)
    v2 = 1.0 + 0.1 * jax.random.uniform(ks[10], (C2,), dtype=jnp.float32)

    out = light_conv(x, w1, g1, b1, m1, v1, w2, g2, b2, m2, v2, k=K)
    out = jax.block_until_ready(out)

    ref = _reference(x, w1, g1, b1, m1, v1, w2, g2, b2, m2, v2, k=K)
    assert out.shape == (N, C2, H, W), out.shape
    max_err = float(jnp.max(jnp.abs(out - ref)))
    assert jnp.allclose(out, ref, atol=5e-3, rtol=5e-3), max_err

    print("KERNEL_OK")
</pallas_src>

<mosaic_0001>
module attributes {stable_mosaic.version = 11 : i64} {
  func.func @_lightconv_kernel(%arg0: i32, %arg1: memref<1x8x256xf32, #tpu.memory_space<vmem>>, %arg2: memref<8x8xf32, #tpu.memory_space<vmem>>, %arg3: memref<8x1xf32, #tpu.memory_space<vmem>>, %arg4: memref<8x9xf32, #tpu.memory_space<vmem>>, %arg5: memref<8x1xf32, #tpu.memory_space<vmem>>, %arg6: memref<9x256xf32, #tpu.memory_space<vmem>>, %arg7: memref<1x8x256xf32, #tpu.memory_space<vmem>>, %arg8: memref<8x256xf32, #tpu.memory_space<vmem>>) attributes {dimension_semantics = [#tpu.dimension_semantics<parallel>], iteration_bounds = array<i64: 2>, scalar_prefetch = 0 : i64, scratch_operands = 1 : i64, tpu.core_type = #tpu.core_type<tc>, window_params = [{transform_indices = @transform_0, window_bounds = array<i64: 1, 8, 256>}, {pipeline_mode = #tpu.pipeline_mode<synchronous>, transform_indices = @transform_1, window_bounds = array<i64: 8, 8>}, {pipeline_mode = #tpu.pipeline_mode<synchronous>, transform_indices = @transform_2, window_bounds = array<i64: 8, 1>}, {pipeline_mode = #tpu.pipeline_mode<synchronous>, transform_indices = @transform_3, window_bounds = array<i64: 8, 9>}, {pipeline_mode = #tpu.pipeline_mode<synchronous>, transform_indices = @transform_4, window_bounds = array<i64: 8, 1>}, {pipeline_mode = #tpu.pipeline_mode<synchronous>, transform_indices = @transform_5, window_bounds = array<i64: 9, 256>}, {transform_indices = @transform_6, window_bounds = array<i64: 1, 8, 256>}]} {
    %c0 = arith.constant 0 : index
    %c0_0 = arith.constant 0 : index
    %0 = vector.load %arg2[%c0, %c0_0] : memref<8x8xf32, #tpu.memory_space<vmem>>, vector<8x8xf32>
    %c0_1 = arith.constant 0 : index
    %c0_2 = arith.constant 0 : index
    %c0_3 = arith.constant 0 : index
    %1 = vector.load %arg1[%c0_1, %c0_2, %c0_3] : memref<1x8x256xf32, #tpu.memory_space<vmem>>, vector<1x8x256xf32>
    %2 = vector.shape_cast %1 : vector<1x8x256xf32> to vector<8x256xf32>
    %cst = arith.constant dense<0.000000e+00> : vector<8x256xf32>
    %3 = tpu.matmul %0, %2, %cst {dimension_numbers = #tpu.dot_dimension_numbers<[1], [0], [0], [1], [0, 0, 1, 1], [], []>} : vector<8x8xf32>, vector<8x256xf32>, vector<8x256xf32> -> vector<8x256xf32>
    %c0_4 = arith.constant 0 : index
    %c0_5 = arith.constant 0 : index
    %4 = vector.load %arg3[%c0_4, %c0_5] : memref<8x1xf32, #tpu.memory_space<vmem>>, vector<8x1xf32>
    %5 = vector.broadcast %4 : vector<8x1xf32> to vector<8x256xf32>
    %6 = arith.addf %3, %5 : vector<8x256xf32>
    %c0_6 = arith.constant 0 : index
    %c4 = arith.constant 4 : index
    %7 = vector.load %arg4[%c0_6, %c4] : memref<8x9xf32, #tpu.memory_space<vmem>>, vector<8x1xf32>
    %8 = vector.broadcast %7 : vector<8x1xf32> to vector<8x256xf32>
    %9 = arith.mulf %6, %8 : vector<8x256xf32>
    %c0_7 = arith.constant 0 : index
    %c0_8 = arith.constant 0 : index
    %10 = vector.load %arg8[%c0_7, %c0_8] : memref<8x256xf32, #tpu.memory_space<vmem>>, vector<8x256xf32>
    tpu.vector_store %arg8[%c0_7, %c0_8], %9 {strides = array<i32>} : memref<8x256xf32, #tpu.memory_space<vmem>>, vector<8x256xf32>,
    %c17_i32 = arith.constant 17 : i32
    %11 = tpu.dynamic_rotate %6 by %c17_i32 dim 1 : vector<8x256xf32>, i32 -> vector<8x256xf32>
    %c0_9 = arith.constant 0 : index
    %c0_10 = arith.constant 0 : index
    %12 = vector.load %arg8[%c0_9, %c0_10] : memref<8x256xf32, #tpu.memory_space<vmem>>, vector<8x256xf32>
    %c0_11 = arith.constant 0 : index
    %c0_12 = arith.constant 0 : index
    %13 = vector.load %arg6[%c0_11, %c0_12] : memref<9x256xf32, #tpu.memory_space<vmem>>, vector<1x256xf32>
    %14 = vector.broadcast %13 : vector<1x256xf32> to vector<8x256xf32>
    %15 = arith.mulf %11, %14 : vector<8x256xf32>
    %c0_13 = arith.constant 0 : index
    %c0_14 = arith.constant 0 : index
    %16 = vector.load %arg4[%c0_13, %c0_14] : memref<8x9xf32, #tpu.memory_space<vmem>>, vector<8x1xf32>
    %17 = vector.broadcast %16 : vector<8x1xf32> to vector<8x256xf32>
    %18 = arith.mulf %15, %17 : vector<8x256xf32>
    %19 = arith.addf %12, %18 : vector<8x256xf32>
    %c0_15 = arith.constant 0 : index
    %c0_16 = arith.constant 0 : index
    %20 = vector.load %arg8[%c0_15, %c0_16] : memref<8x256xf32, #tpu.memory_space<vmem>>, vector<8x256xf32>
    tpu.vector_store %arg8[%c0_15, %c0_16], %19 {strides = array<i32>} : memref<8x256xf32, #tpu.memory_space<vmem>>, vector<8x256xf32>,
    %c16_i32 = arith.constant 16 : i32
    %21 = tpu.dynamic_rotate %6 by %c16_i32 dim 1 : vector<8x256xf32>, i32 -> vector<8x256xf32>
    %c0_17 = arith.constant 0 : index
    %c0_18 = arith.constant 0 : index
    %22 = vector.load %arg8[%c0_17, %c0_18] : memref<8x256xf32, #tpu.memory_space<vmem>>, vector<8x256xf32>
    %c1 = arith.constant 1 : index
    %c0_19 = arith.constant 0 : index
    %23 = vector.load %arg6[%c1, %c0_19] : memref<9x256xf32, #tpu.memory_space<vmem>>, vector<1x256xf32>
    %24 = vector.broadcast %23 : vector<1x256xf32> to vector<8x256xf32>
    %25 = arith.mulf %21, %24 : vector<8x256xf32>
    %c0_20 = arith.constant 0 : index
    %c1_21 = arith.constant 1 : index
    %26 = vector.load %arg4[%c0_20, %c1_21] : memref<8x9xf32, #tpu.memory_space<vmem>>, vector<8x1xf32>
    %27 = vector.broadcast %26 : vector<8x1xf32> to vector<8x256xf32>
    %28 = arith.mulf %25, %27 : vector<8x256xf32>
    %29 = arith.addf %22, %28 : vector<8x256xf32>
    %c0_22 = arith.constant 0 : index
    %c0_23 = arith.constant 0 : index
    %30 = vector.load %arg8[%c0_22, %c0_23] : memref<8x256xf32, #tpu.memory_space<vmem>>, vector<8x256xf32>
    tpu.vector_store %arg8[%c0_22, %c0_23], %29 {strides = array<i32>} : memref<8x256xf32, #tpu.memory_space<vmem>>, vector<8x256xf32>,
    %c15_i32 = arith.constant 15 : i32
    %31 = tpu.dynamic_rotate %6 by %c15_i32 dim 1 : vector<8x256xf32>, i32 -> vector<8x256xf32>
    %c0_24 = arith.constant 0 : index
    %c0_25 = arith.constant 0 : index
    %32 = vector.load %arg8[%c0_24, %c0_25] : memref<8x256xf32, #tpu.memory_space<vmem>>, vector<8x256xf32>
    %c2 = arith.constant 2 : index
    %c0_26 = arith.constant 0 : index
    %33 = vector.load %arg6[%c2, %c0_26] : memref<9x256xf32, #tpu.memory_space<vmem>>, vector<1x256xf32>
    %34 = vector.broadcast %33 : vector<1x256xf32> to vector<8x256xf32>
    %35 = arith.mulf %31, %34 : vector<8x256xf32>
    %c0_27 = arith.constant 0 : index
    %c2_28 = arith.constant 2 : index
    %36 = vector.load %arg4[%c0_27, %c2_28] : memref<8x9xf32, #tpu.memory_space<vmem>>, vector<8x1xf32>
    %37 = vector.broadcast %36 : vector<8x1xf32> to vector<8x256xf32>
    %38 = arith.mulf %35, %37 : vector<8x256xf32>
    %39 = arith.addf %32, %38 : vector<8x256xf32>
    %c0_29 = arith.constant 0 : index
    %c0_30 = arith.constant 0 : index
    %40 = vector.load %arg8[%c0_29, %c0_30] : memref<8x256xf32, #tpu.memory_space<vmem>>, vector<8x256xf32>
    tpu.vector_store %arg8[%c0_29, %c0_30], %39 {strides = array<i32>} : memref<8x256xf32, #tpu.memory_space<vmem>>, vector<8x256xf32>,
    %c1_i32 = arith.constant 1 : i32
    %41 = tpu.dynamic_rotate %6 by %c1_i32 dim 1 : vector<8x256xf32>, i32 -> vector<8x256xf32>
    %c0_31 = arith.constant 0 : index
    %c0_32 = arith.constant 0 : index
    %42 = vector.load %arg8[%c0_31, %c0_32] : memref<8x256xf32, #tpu.memory_space<vmem>>, vector<8x256xf32>
    %c3 = arith.constant 3 : index
    %c0_33 = arith.constant 0 : index
    %43 = vector.load %arg6[%c3, %c0_33] : memref<9x256xf32, #tpu.memory_space<vmem>>, vector<1x256xf32>
    %44 = vector.broadcast %43 : vector<1x256xf32> to vector<8x256xf32>
    %45 = arith.mulf %41, %44 : vector<8x256xf32>
    %c0_34 = arith.constant 0 : index
    %c3_35 = arith.constant 3 : index
    %46 = vector.load %arg4[%c0_34, %c3_35] : memref<8x9xf32, #tpu.memory_space<vmem>>, vector<8x1xf32>
    %47 = vector.broadcast %46 : vector<8x1xf32> to vector<8x256xf32>
    %48 = arith.mulf %45, %47 : vector<8x256xf32>
    %49 = arith.addf %42, %48 : vector<8x256xf32>
    %c0_36 = arith.constant 0 : index
    %c0_37 = arith.constant 0 : index
    %50 = vector.load %arg8[%c0_36, %c0_37] : memref<8x256xf32, #tpu.memory_space<vmem>>, vector<8x256xf32>
    tpu.vector_store %arg8[%c0_36, %c0_37], %49 {strides = array<i32>} : memref<8x256xf32, #tpu.memory_space<vmem>>, vector<8x256xf32>,
    %c255_i32 = arith.constant 255 : i32
    %51 = tpu.dynamic_rotate %6 by %c255_i32 dim 1 : vector<8x256xf32>, i32 -> vector<8x256xf32>
    %c0_38 = arith.constant 0 : index
    %c0_39 = arith.constant 0 : index
    %52 = vector.load %arg8[%c0_38, %c0_39] : memref<8x256xf32, #tpu.memory_space<vmem>>, vector<8x256xf32>
    %c5 = arith.constant 5 : index
    %c0_40 = arith.constant 0 : index
    %53 = vector.load %arg6[%c5, %c0_40] : memref<9x256xf32, #tpu.memory_space<vmem>>, vector<1x256xf32>
    %54 = vector.broadcast %53 : vector<1x256xf32> to vector<8x256xf32>
    %55 = arith.mulf %51, %54 : vector<8x256xf32>
    %c0_41 = arith.constant 0 : index
    %c5_42 = arith.constant 5 : index
    %56 = vector.load %arg4[%c0_41, %c5_42] : memref<8x9xf32, #tpu.memory_space<vmem>>, vector<8x1xf32>
    %57 = vector.broadcast %56 : vector<8x1xf32> to vector<8x256xf32>
    %58 = arith.mulf %55, %57 : vector<8x256xf32>
    %59 = arith.addf %52, %58 : vector<8x256xf32>
    %c0_43 = arith.constant 0 : index
    %c0_44 = arith.constant 0 : index
    %60 = vector.load %arg8[%c0_43, %c0_44] : memref<8x256xf32, #tpu.memory_space<vmem>>, vector<8x256xf32>
    tpu.vector_store %arg8[%c0_43, %c0_44], %59 {strides = array<i32>} : memref<8x256xf32, #tpu.memory_space<vmem>>, vector<8x256xf32>,
    %c241_i32 = arith.constant 241 : i32
    %61 = tpu.dynamic_rotate %6 by %c241_i32 dim 1 : vector<8x256xf32>, i32 -> vector<8x256xf32>
    %c0_45 = arith.constant 0 : index
    %c0_46 = arith.constant 0 : index
    %62 = vector.load %arg8[%c0_45, %c0_46] : memref<8x256xf32, #tpu.memory_space<vmem>>, vector<8x256xf32>
    %c6 = arith.constant 6 : index
    %c0_47 = arith.constant 0 : index
    %63 = vector.load %arg6[%c6, %c0_47] : memref<9x256xf32, #tpu.memory_space<vmem>>, vector<1x256xf32>
    %64 = vector.broadcast %63 : vector<1x256xf32> to vector<8x256xf32>
    %65 = arith.mulf %61, %64 : vector<8x256xf32>
    %c0_48 = arith.constant 0 : index
    %c6_49 = arith.constant 6 : index
    %66 = vector.load %arg4[%c0_48, %c6_49] : memref<8x9xf32, #tpu.memory_space<vmem>>, vector<8x1xf32>
    %67 = vector.broadcast %66 : vector<8x1xf32> to vector<8x256xf32>
    %68 = arith.mulf %65, %67 : vector<8x256xf32>
    %69 = arith.addf %62, %68 : vector<8x256xf32>
    %c0_50 = arith.constant 0 : index
    %c0_51 = arith.constant 0 : index
    %70 = vector.load %arg8[%c0_50, %c0_51] : memref<8x256xf32, #tpu.memory_space<vmem>>, vector<8x256xf32>
    tpu.vector_store %arg8[%c0_50, %c0_51], %69 {strides = array<i32>} : memref<8x256xf32, #tpu.memory_space<vmem>>, vector<8x256xf32>,
    %c240_i32 = arith.constant 240 : i32
    %71 = tpu.dynamic_rotate %6 by %c240_i32 dim 1 : vector<8x256xf32>, i32 -> vector<8x256xf32>
    %c0_52 = arith.constant 0 : index
    %c0_53 = arith.constant 0 : index
    %72 = vector.load %arg8[%c0_52, %c0_53] : memref<8x256xf32, #tpu.memory_space<vmem>>, vector<8x256xf32>
    %c7 = arith.constant 7 : index
    %c0_54 = arith.constant 0 : index
    %73 = vector.load %arg6[%c7, %c0_54] : memref<9x256xf32, #tpu.memory_space<vmem>>, vector<1x256xf32>
    %74 = vector.broadcast %73 : vector<1x256xf32> to vector<8x256xf32>
    %75 = arith.mulf %71, %74 : vector<8x256xf32>
    %c0_55 = arith.constant 0 : index
    %c7_56 = arith.constant 7 : index
    %76 = vector.load %arg4[%c0_55, %c7_56] : memref<8x9xf32, #tpu.memory_space<vmem>>, vector<8x1xf32>
    %77 = vector.broadcast %76 : vector<8x1xf32> to vector<8x256xf32>
    %78 = arith.mulf %75, %77 : vector<8x256xf32>
    %79 = arith.addf %72, %78 : vector<8x256xf32>
    %c0_57 = arith.constant 0 : index
    %c0_58 = arith.constant 0 : index
    %80 = vector.load %arg8[%c0_57, %c0_58] : memref<8x256xf32, #tpu.memory_space<vmem>>, vector<8x256xf32>
    tpu.vector_store %arg8[%c0_57, %c0_58], %79 {strides = array<i32>} : memref<8x256xf32, #tpu.memory_space<vmem>>, vector<8x256xf32>,
    %c239_i32 = arith.constant 239 : i32
    %81 = tpu.dynamic_rotate %6 by %c239_i32 dim 1 : vector<8x256xf32>, i32 -> vector<8x256xf32>
    %c0_59 = arith.constant 0 : index
    %c0_60 = arith.constant 0 : index
    %82 = vector.load %arg8[%c0_59, %c0_60] : memref<8x256xf32, #tpu.memory_space<vmem>>, vector<8x256xf32>
    %c8 = arith.constant 8 : index
    %c0_61 = arith.constant 0 : index
    %83 = vector.load %arg6[%c8, %c0_61] : memref<9x256xf32, #tpu.memory_space<vmem>>, vector<1x256xf32>
    %84 = vector.broadcast %83 : vector<1x256xf32> to vector<8x256xf32>
    %85 = arith.mulf %81, %84 : vector<8x256xf32>
    %c0_62 = arith.constant 0 : index
    %c8_63 = arith.constant 8 : index
    %86 = vector.load %arg4[%c0_62, %c8_63] : memref<8x9xf32, #tpu.memory_space<vmem>>, vector<8x1xf32>
    %87 = vector.broadcast %86 : vector<8x1xf32> to vector<8x256xf32>
    %88 = arith.mulf %85, %87 : vector<8x256xf32>
    %89 = arith.addf %82, %88 : vector<8x256xf32>
    %c0_64 = arith.constant 0 : index
    %c0_65 = arith.constant 0 : index
    %90 = vector.load %arg8[%c0_64, %c0_65] : memref<8x256xf32, #tpu.memory_space<vmem>>, vector<8x256xf32>
    tpu.vector_store %arg8[%c0_64, %c0_65], %89 {strides = array<i32>} : memref<8x256xf32, #tpu.memory_space<vmem>>, vector<8x256xf32>,
    %c0_66 = arith.constant 0 : index
    %c0_67 = arith.constant 0 : index
    %91 = vector.load %arg8[%c0_66, %c0_67] : memref<8x256xf32, #tpu.memory_space<vmem>>, vector<8x256xf32>
    %c0_68 = arith.constant 0 : index
    %c0_69 = arith.constant 0 : index
    %92 = vector.load %arg5[%c0_68, %c0_69] : memref<8x1xf32, #tpu.memory_space<vmem>>, vector<8x1xf32>
    %93 = vector.broadcast %92 : vector<8x1xf32> to vector<8x256xf32>
    %94 = arith.addf %91, %93 : vector<8x256xf32>
    %cst_70 = arith.constant 0.000000e+00 : f32
    %95 = vector.broadcast %cst_70 : f32 to vector<8x256xf32>
    %96 = arith.maximumf %94, %95 : vector<8x256xf32>
    %c0_71 = arith.constant 0 : index
    %c0_72 = arith.constant 0 : index
    %c0_73 = arith.constant 0 : index
    %97 = vector.load %arg7[%c0_71, %c0_72, %c0_73] : memref<1x8x256xf32, #tpu.memory_space<vmem>>, vector<1x8x256xf32>
    %98 = vector.shape_cast %97 : vector<1x8x256xf32> to vector<8x256xf32>
    %99 = vector.shape_cast %96 : vector<8x256xf32> to vector<1x8x256xf32>
    tpu.vector_store %arg7[%c0_71, %c0_72, %c0_73], %99 {strides = array<i32>} : memref<1x8x256xf32, #tpu.memory_space<vmem>>, vector<1x8x256xf32>,
    return
  }
  func.func @transform_0(%arg0: i32) -> (i32, i32, i32) {
    %c0_i32 = arith.constant 0 : i32
    %c0_i32_0 = arith.constant 0 : i32
    %c0_i32_1 = arith.constant 0 : i32
    return %arg0, %c0_i32, %c0_i32_0 : i32, i32, i32
  }
  func.func @transform_1(%arg0: i32) -> (i32, i32) {
    %c0_i32 = arith.constant 0 : i32
    %c0_i32_0 = arith.constant 0 : i32
    %c0_i32_1 = arith.constant 0 : i32
    return %c0_i32, %c0_i32_0 : i32, i32
  }
  func.func @transform_2(%arg0: i32) -> (i32, i32) {
    %c0_i32 = arith.constant 0 : i32
    %c0_i32_0 = arith.constant 0 : i32
    %c0_i32_1 = arith.constant 0 : i32
    return %c0_i32, %c0_i32_0 : i32, i32
  }
  func.func @transform_3(%arg0: i32) -> (i32, i32) {
    %c0_i32 = arith.constant 0 : i32
    %c0_i32_0 = arith.constant 0 : i32
    %c0_i32_1 = arith.constant 0 : i32
    return %c0_i32, %c0_i32_0 : i32, i32
  }
  func.func @transform_4(%arg0: i32) -> (i32, i32) {
    %c0_i32 = arith.constant 0 : i32
    %c0_i32_0 = arith.constant 0 : i32
    %c0_i32_1 = arith.constant 0 : i32
    return %c0_i32, %c0_i32_0 : i32, i32
  }
  func.func @transform_5(%arg0: i32) -> (i32, i32) {
    %c0_i32 = arith.constant 0 : i32
    %c0_i32_0 = arith.constant 0 : i32
    %c0_i32_1 = arith.constant 0 : i32
    return %c0_i32, %c0_i32_0 : i32, i32
  }
  func.func @transform_6(%arg0: i32) -> (i32, i32, i32) {
    %c0_i32 = arith.constant 0 : i32
    %c0_i32_0 = arith.constant 0 : i32
    %c0_i32_1 = arith.constant 0 : i32
    return %arg0, %c0_i32, %c0_i32_0 : i32, i32, i32
  }
}

</mosaic_0001>

<bundles_post_ra>
// kernel: light_conv.1
= control target key start
LH: loop header
LB: loop body
LE: loop exit
PB: predicated region body
PF: predicated region fallthrough
CT: control target
= control target key end

     0   :  { %s823_s21 = smov 0   ;;  %s979_s0 = inlined_call_operand.vmem [shape: f32[2,8,256], index: 0, kind: input, shape index: {}]   ;;  %s980_s1 = inlined_call_operand.vmem [shape: f32[8,8], index: 1, kind: input, shape index: {}]   ;;  %s981_s2 = inlined_call_operand.vmem [shape: f32[8,1], index: 2, kind: input, shape index: {}]   ;;  %s982_s3 = inlined_call_operand.vmem [shape: f32[8,9], index: 3, kind: input, shape index: {}]   ;;  %s983_s4 = inlined_call_operand.vmem [shape: f32[8,1], index: 4, kind: input, shape index: {}]   ;;  %s984_s5 = inlined_call_operand.vmem [shape: f32[9,256], index: 5, kind: input, shape index: {}]   ;;  %s985_s6 = inlined_call_operand.vmem [shape: f32[2,8,256], index: 6, kind: output, shape index: {}]  }
   0x1 LB: > { %s704_s22 = sadd.s32 4294967295, %s768_s21   ;;  %p708_p0 = scmp.ge.s32.totalorder %s768_s21, 1  ;;  %s768_s21 = sphi %s823_s21, %s16_s21  }
   0x2   : > { %p212_p1 = scmp.lt.s32.totalorder %s768_s21, 3 }
   0x4   : > { %p213_p2 = pnand %p708_p0, %p212_p1 }
   0x5   : > { %p242_p3 = scmp.lt.s32.totalorder (!%p213_p2), %s704_s22, 1  ;;  %v255_v0 = vld [vmem:[%s981_s2] sm:$0xff] (!%p213_p2)  ;;  %v770_v1 = vmov (!%p213_p2), 0.0   ;;  %v771_v2 = vmov (!%p213_p2), 0   ;;  %vm261_vm0 = vcmask (!%p213_p2), 64512   ;;  %v772_v7 = vmov (!%p213_p2), 4  }
   0x6   : > { %216 = sbr.rel (%p213_p2) target bundleno = 408 (0x198), region = 44  ;;  %329 = vmatprep.mubr.f32.mxu0 (!%p213_p2), %v770_v1  ;;  %751 = vset.pattern.permute.xlu0 (!%p213_p2), %v771_v2  ;;  %v336_v3 = vld [vmem:[%s982_s3] sm:$0xff] (!%p213_p2)  ;;  %v773_v8 = vmov (!%p213_p2), 1   ;;  %v774_v9 = vmov (!%p213_p2), 3   ;;  %v775_v10 = vmov (!%p213_p2), 2   ;;  %v776_v11 = vmov (!%p213_p2), 5  }
   0x7   : > { %258 = vperm.xlu0 (!%p213_p2), %751, %v255_v0   ;;  %753 = vset.pattern.permute.xlu1 (!%p213_p2), %v771_v2  ;;  %v252_v6 = vld [vmem:[%s980_s1] sm:$0xff] (!%p213_p2)  ;;  %v777_v12 = vmov (!%p213_p2), 6   ;;  %v778_v13 = vmov (!%p213_p2), 7   ;;  %v779_v14 = vmov (!%p213_p2), 8   ;;  %s780_s9 = smov (!%p213_p2), 16   ;;  %s781_s10 = smov (!%p213_p2), 17   ;;  %v350_v33 = vlaneseq (!%p213_p2) }
   0x8   : > { %374 = vperm.xlu1 (!%p213_p2), %753, %v336_v3   ;;  %s782_s11 = smov (!%p213_p2), 15   ;;  %s783_s12 = smov (!%p213_p2), 1   ;;  %v637_v20 = vld [vmem:[%s983_s4] sm:$0xff] (!%p213_p2) }
   0x9   : > { %s784_s13 = smov (!%p213_p2), 111   ;;  %s785_s14 = smov (!%p213_p2), 127   ;;  %v360_v36 = vshrl.u32 (!%p213_p2), %v350_v33, 7  ;;  %v883_v37 = vand.u32 (!%p213_p2), 127, %v350_v33 }
   0xa   : > { %s786_s17 = smov (!%p213_p2), 113   ;;  %s787_s18 = smov (!%p213_p2), 112   ;;  %v357_v41 = vld [vmem:[%s984_s5] ss:$8 sm:$0x3] (!%p213_p2) }
   0xb   : > { %752 = vset.pattern.permute.xlu0 (!%p213_p2), %v772_v7  ;;  %v887_v39 = vsub.s32 (!%p213_p2), 0, %v360_v36  ;;  %v889_v40 = vsub.s32 (!%p213_p2), 1, %v360_v36  ;;  %vm352_vm1 = vcmp.lt.s32.totalorder (!%p213_p2), %v883_v37, 17  ;;  %v714_v44 = vld [vmem:[%s984_s5 + $0x1] ss:$8 sm:$0x3] (!%p213_p2) }
   0xc   : > { %339 = vperm.xlu0 (!%p213_p2), %752, %v336_v3   ;;  %754 = vset.pattern.permute.xlu1 (!%p213_p2), %v773_v8  ;;  %vm387_vm2 = vcmp.lt.s32.totalorder (!%p213_p2), %v883_v37, 16  ;;  %v715_v51 = vld [vmem:[%s984_s5 + $0x2] ss:$8 sm:$0x3] (!%p213_p2)  ;;  %vm423_vm3 = vcmp.lt.s32.totalorder (!%p213_p2), %v883_v37, 15  ;;  %vm459_vm4 = vcmp.lt.s32.totalorder (!%p213_p2), %v883_v37, 1 }
   0xd   : > { %s987_s22 = smov (!%p242_p3, %s704_s22), 1  ;;  %410 = vperm.xlu1 %754, %v336_v3   ;;  %v362_v45 = vrot.slane %v357_v41, %v887_v39  ;;  %v366_v46 = vrot.slane %v357_v41, %v889_v40  ;;  %v398_v49 = vrot.slane %v714_v44, %v887_v39  ;;  %v402_v50 = vrot.slane %v714_v44, %v889_v40  ;;  %v716_v57 = vld [vmem:[%s984_s5 + $0x3] ss:$8 sm:$0x3] }
   0xe   : > { %s723_s27 = sshll.u32 %s987_s22, 4  ;;  %v434_v58 = vrot.slane %v715_v51, %v887_v39  ;;  %v438_v59 = vrot.slane %v715_v51, %v889_v40  ;;  %v717_v1 = vld [vmem:[%s984_s5 + $0x5] ss:$8 sm:$0x3]  ;;  %vm495_vm5 = vcmp.lt.s32.totalorder %v883_v37, 127  ;;  %vm531_vm6 = vcmp.lt.s32.totalorder %v883_v37, 113 }
   0xf   : > { %s246_s30 = scalar_lea.vmem %s979_s0, %s723_s27  ;;  %vm567_vm7 = vcmp.lt.s32.totalorder %v883_v37, 112  ;;  %vm603_vm8 = vcmp.lt.s32.totalorder %v883_v37, 111  ;;  %s251_s16 = scalar_lea.vmem %s985_s6, %s723_s27 }
  0x10   : > { %v254_v4 = vld [vmem:[%s246_s30 + $0x8] sm:$0xff]  ;;  %v253_v5 = vld [vmem:[%s246_s30] sm:$0xff]  ;;  %756 = vset.pattern.permute.xlu0 %v774_v9 }
  0x11   : > { %265 = vmatprep.subr.mxu0 %v254_v4  ;;  %482 = vperm.xlu0 %756, %v336_v3   ;;  %v474_v4 = vrot.slane %v716_v57, %v889_v40 }
  0x12   : > { %266 = vmatpush1.msra.mxu0 %v253_v5  ;;  %755 = vset.pattern.permute.xlu1 %v775_v10 }
  0x13   : > { %713 = vmatmul.mubr.msk.f32.vlgmr.msra.gmra.mrb[0].mxu0 %vm261_vm0, %v252_v6  ;;  %446 = vperm.xlu1 %755, %v336_v3  }
  0x15   : > { %757 = vset.pattern.permute.xlu0 %v776_v11 }
  0x16   : > { %518 = vperm.xlu0 %757, %v336_v3  }
  0x1a   : > { %758 = vset.pattern.permute.xlu0 %v777_v12  ;;  %v506_v12 = vrot.slane %v717_v1, %v887_v39 }
  0x1b   : > { %554 = vperm.xlu0 %758, %v336_v3  }
  0x1f   : > { %759 = vset.pattern.permute.xlu0 %v778_v13  ;;  %v718_v13 = vld [vmem:[%s984_s5 + $0x6] ss:$8 sm:$0x3] }
  0x20   : > { %590 = vperm.xlu0 %759, %v336_v3  }
  0x24   : > { %760 = vset.pattern.permute.xlu0 %v779_v14 }
  0x86   : > { %v259_v15 = vpop.permute.xlu0 %258 }
  0x87   : > { %v375_v21 = vpop.permute.xlu1 %374 }
  0x8b   : > { %v340_v23 = vpop.permute.xlu0 %339 }
  0x8c   : > { %v411_v22 = vpop.permute.xlu1 %410 }
  0x90   : > { %v871_v24 = vpop.permute.xlu0 %482 }
  0x92   : > { %v873_v25 = vpop.permute.xlu1 %446 }
  0x95   : > { %v875_v26 = vpop.permute.xlu0 %518 }
  0x9a   : > { %v877_v29 = vpop.permute.xlu0 %554 }
  0x9f   : > { %v879_v31 = vpop.permute.xlu0 %590 }
  0xe6   : > { %v331_v16 = vpop.f32.mrb[0].mxu0 }
  0xe7   : > { %v848_v17 = vadd.f32 %v331_v16, %v259_v15  ;;  %v333_v18 = vpop.f32.mrb[1].mxu0  ;;  %v510_v16 = vrot.slane %v717_v1, %v889_v40 }
  0xe8   : > { %v852_v19 = vadd.f32 %v333_v18, %v259_v15 }
  0xe9   : > { %383 = vrot.lane.b32.xlu0 %v848_v17, %s780_s9  ;;  %346 = vrot.lane.b32.xlu1 %v848_v17, %s781_s10 }
  0xea   : > { %v343_v9 = vmul.f32 %v340_v23, %v852_v19 }
  0xed   : > { %348 = vrot.lane.b32.xlu0 %v852_v19, %s781_s10  ;;  %419 = vrot.lane.b32.xlu1 %v848_v17, %s782_s11 }
  0xf1   : > { %626 = vperm.xlu0 %760, %v336_v3   ;;  %455 = vrot.lane.b32.xlu1 %v848_v17, %s783_s12  ;;  %v470_v3 = vrot.slane %v716_v57, %v887_v39 }
  0xf5   : > { %599 = vrot.lane.b32.xlu0 %v848_v17, %s784_s13  ;;  %491 = vrot.lane.b32.xlu1 %v848_v17, %s785_s14 }
  0xf6   : > { %761 = vset.pattern.permute.xlu0 %v771_v2  ;;  %v342_v2 = vmul.f32 %v340_v23, %v848_v17 }
  0xf9   : > { %527 = vrot.lane.b32.xlu1 %v848_v17, %s786_s17  ;;  %640 = vperm.xlu0 %761, %v637_v20  }
  0xfd   : > { %563 = vrot.lane.b32.xlu1 %v848_v17, %s787_s18 }
 0x101   : > { %385 = vrot.lane.b32.xlu1 %v852_v19, %s780_s9 }
 0x105   : > { %421 = vrot.lane.b32.xlu1 %v852_v19, %s782_s11 }
 0x109   : > { %457 = vrot.lane.b32.xlu1 %v852_v19, %s783_s12 }
 0x10d   : > { %493 = vrot.lane.b32.xlu1 %v852_v19, %s785_s14 }
 0x111   : > { %529 = vrot.lane.b32.xlu1 %v852_v19, %s786_s17 }
 0x115   : > { %565 = vrot.lane.b32.xlu1 %v852_v19, %s787_s18 }
 0x119   : > { %601 = vrot.lane.b32.xlu1 %v852_v19, %s784_s13 }
 0x15b   : > { %v347_v27 = vpop.permute.xlu1 %346  ;;  %v384_v35 = vpop.permute.xlu0 %383 }
 0x15f   : > { %v420_v28 = vpop.permute.xlu1 %419  ;;  %v349_v42 = vpop.permute.xlu0 %348 }
 0x160   : > { %v353_v47 = vsel %vm352_vm1, %v347_v27, %v349_v42  ;;  %v354_v48 = vsel %vm352_vm1, %v349_v42, %v347_v27 }
 0x161   : > { %v369_v55 = vmul.f32 %v362_v45, %v354_v48  ;;  %v370_v56 = vmul.f32 %v366_v46, %v353_v47  ;;  %v720_v47 = vld [vmem:[%s984_s5 + $0x10] ss:$8 sm:$0x3] }
 0x162   : > { %v618_v57 = vrot.slane %v720_v47, %v889_v40 }
 0x163   : > { %v456_v30 = vpop.permute.xlu1 %455  ;;  %v377_v5 = vmul.f32 %v375_v21, %v369_v55  ;;  %v378_v6 = vmul.f32 %v375_v21, %v370_v56  ;;  %v614_v56 = vrot.slane %v720_v47, %v887_v39 }
 0x165   : > { %v379_v23 = vadd.f32 %v377_v5, %v342_v2  ;;  %v380_v27 = vadd.f32 %v378_v6, %v343_v9 }
 0x167   : > { %v492_v32 = vpop.permute.xlu1 %491 }
 0x16b   : > { %v881_v34 = vpop.permute.xlu1 %527 }
 0x16f   : > { %v885_v38 = vpop.permute.xlu1 %563 }
 0x170   : > { %v627_v48 = vpop.permute.xlu0 %626 }
 0x173   : > { %v386_v43 = vpop.permute.xlu1 %385 }
 0x174   : > { %v388_v53 = vsel %vm387_vm2, %v384_v35, %v386_v43  ;;  %v389_v54 = vsel %vm387_vm2, %v386_v43, %v384_v35  ;;  %v719_v35 = vld [vmem:[%s984_s5 + $0x7] ss:$8 sm:$0x3]  ;;  %v600_v1 = vpop.permute.xlu0 %599 }
 0x175   : > { %v405_v60 = vmul.f32 %v398_v49, %v389_v54  ;;  %v406_v61 = vmul.f32 %v402_v50, %v388_v53  ;;  %v578_v51 = vrot.slane %v719_v35, %v887_v39 }
 0x177   : > { %v422_v52 = vpop.permute.xlu1 %421  ;;  %v413_v14 = vmul.f32 %v411_v22, %v405_v60  ;;  %v414_v15 = vmul.f32 %v411_v22, %v406_v61 }
 0x178   : > { %v424_v62 = vsel %vm423_vm3, %v420_v28, %v422_v52  ;;  %v425_v63 = vsel %vm423_vm3, %v422_v52, %v420_v28  ;;  %v542_v28 = vrot.slane %v718_v13, %v887_v39  ;;  %v582_v52 = vrot.slane %v719_v35, %v889_v40 }
 0x179   : > { %v441_v10 = vmul.f32 %v434_v58, %v425_v63  ;;  %v442_v11 = vmul.f32 %v438_v59, %v424_v62  ;;  %v415_v36 = vadd.f32 %v413_v14, %v379_v23  ;;  %v416_v41 = vadd.f32 %v414_v15, %v380_v27 }
 0x17b   : > { %v458_v0 = vpop.permute.xlu1 %457  ;;  %v449_v22 = vmul.f32 %v873_v25, %v441_v10  ;;  %v450_v33 = vmul.f32 %v873_v25, %v442_v11 }
 0x17c   : > { %v460_v7 = vsel %vm459_vm4, %v456_v30, %v458_v0  ;;  %v461_v8 = vsel %vm459_vm4, %v458_v0, %v456_v30  ;;  %v546_v30 = vrot.slane %v718_v13, %v889_v40  ;;  %v641_v13 = vpop.permute.xlu0 %640 }
 0x17d   : > { %v477_v18 = vmul.f32 %v470_v3, %v461_v8  ;;  %v478_v20 = vmul.f32 %v474_v4, %v460_v7  ;;  %v452_v53 = vadd.f32 %v450_v33, %v416_v41 }
 0x17f   : > { %v494_v17 = vpop.permute.xlu1 %493  ;;  %v485_v44 = vmul.f32 %v871_v24, %v477_v18  ;;  %v486_v45 = vmul.f32 %v871_v24, %v478_v20  ;;  %v451_v24 = vadd.f32 %v449_v22, %v415_v36 }
 0x180   : > { %v496_v19 = vsel %vm495_vm5, %v492_v32, %v494_v17  ;;  %v497_v21 = vsel %vm495_vm5, %v494_v17, %v492_v32 }
 0x181   : > { %v513_v42 = vmul.f32 %v506_v12, %v496_v19  ;;  %v514_v32 = vmul.f32 %v510_v16, %v497_v21  ;;  %v487_v58 = vadd.f32 %v485_v44, %v451_v24  ;;  %v488_v59 = vadd.f32 %v486_v45, %v452_v53 }
 0x183   : > { %v530_v43 = vpop.permute.xlu1 %529  ;;  %v521_v54 = vmul.f32 %v875_v26, %v513_v42  ;;  %v522_v55 = vmul.f32 %v875_v26, %v514_v32 }
 0x184   : > { %v532_v46 = vsel %vm531_vm6, %v881_v34, %v530_v43  ;;  %v533_v25 = vsel %vm531_vm6, %v530_v43, %v881_v34 }
 0x185   : > { %v549_v49 = vmul.f32 %v542_v28, %v532_v46  ;;  %v550_v50 = vmul.f32 %v546_v30, %v533_v25  ;;  %v523_v39 = vadd.f32 %v521_v54, %v487_v58  ;;  %v524_v2 = vadd.f32 %v522_v55, %v488_v59 }
 0x187   : > { %v566_v34 = vpop.permute.xlu1 %565  ;;  %v557_v62 = vmul.f32 %v877_v29, %v549_v49  ;;  %v558_v63 = vmul.f32 %v877_v29, %v550_v50 }
 0x188   : > { %v568_v60 = vsel %vm567_vm7, %v885_v38, %v566_v34  ;;  %v569_v61 = vsel %vm567_vm7, %v566_v34, %v885_v38 }
 0x189   : > { %v585_v26 = vmul.f32 %v578_v51, %v568_v60  ;;  %v586_v0 = vmul.f32 %v582_v52, %v569_v61  ;;  %v559_v29 = vadd.f32 %v557_v62, %v523_v39  ;;  %v560_v8 = vadd.f32 %v558_v63, %v524_v2 }
 0x18b   : > { %v593_v40 = vmul.f32 %v879_v31, %v585_v26  ;;  %v594_v3 = vmul.f32 %v879_v31, %v586_v0  ;;  %v602_v4 = vpop.permute.xlu1 %601 }
 0x18c   : > { %v604_v5 = vsel %vm603_vm8, %v600_v1, %v602_v4  ;;  %v605_v38 = vsel %vm603_vm8, %v602_v4, %v600_v1 }
 0x18d   : > { %v621_v6 = vmul.f32 %v614_v56, %v604_v5  ;;  %v622_v7 = vmul.f32 %v618_v57, %v605_v38  ;;  %v595_v9 = vadd.f32 %v593_v40, %v559_v29  ;;  %v596_v10 = vadd.f32 %v594_v3, %v560_v8 }
 0x18f   : > { %v629_v11 = vmul.f32 %v627_v48, %v621_v6  ;;  %v630_v12 = vmul.f32 %v627_v48, %v622_v7 }
 0x191   : > { %v631_v14 = vadd.f32 %v629_v11, %v595_v9  ;;  %v632_v15 = vadd.f32 %v630_v12, %v596_v10 }
 0x193   : > { %v643_v31 = vadd.f32 %v641_v13, %v631_v14  ;;  %v644_v16 = vadd.f32 %v641_v13, %v632_v15 }
 0x195   : > { %v645_v37 = vmax.f32 %v643_v31, 0.0  ;;  %v646_v17 = vmax.f32 %v644_v16, 0.0 }
 0x197   : > { %647 = vst [vmem:[%s251_s16] sm:$0xff] %v645_v37  ;;  %648 = vst [vmem:[%s251_s16 + $0x8] sm:$0xff] %v646_v17 }
 0x198 PF: > { %s16_s21 = sadd.s32 1, %s768_s21  }
 0x199   : > { %p13_p4 = scmp.ge.s32.totalorder %s16_s21, 4  }
 0x19b   :  { %15 = sbr.rel (!%p13_p4) target bundleno = 1 (0x1), region = 81 }

</bundles_post_ra>
